<compile_context>
chip_gen: v7x
topology: tpu7x:2x2x1
jax: 0.10.0
libtpu: 0.0.40
codegen_flags: <defaults>
</compile_context>

<pallas_src>
import math

import jax
import jax.numpy as jnp
from jax.experimental import pallas as pl
from jax.experimental.pallas import tpu as pltpu

_TILE_BYTES = 4 * 1024 * 1024          # target bytes per x tile (per grid step)
_VMEM_LIMIT = 48 * 1024 * 1024         # scoped-VMEM limit: safe on v5e/v6e/v7x


def _build_pe(d_model: int, max_seq_length: int) -> jnp.ndarray:
    """Sinusoidal table identical to the PyTorch __init__ (odd d_model safe)."""
    position = jnp.arange(max_seq_length, dtype=jnp.float32)[:, None]          # (L, 1)
    div_term = jnp.exp(jnp.arange(0, d_model, 2, dtype=jnp.float32)
                       * -(math.log(10000.0) / d_model))                       # (ceil(D/2),)
    pe = jnp.zeros((max_seq_length, d_model), dtype=jnp.float32)
    pe = pe.at[:, 0::2].set(jnp.sin(position * div_term))
    pe = pe.at[:, 1::2].set(jnp.cos(position * div_term[: d_model // 2]))
    return pe                                                                  # (L, D)


def _add_pe_kernel(x_ref, pe_ref, o_ref):
    # 2D path: x (tR, tC) + pe (1, tC);  3D path: x (1, tS, D) + pe (tS, D).
    x = x_ref[...].astype(jnp.float32)
    p = pe_ref[...].astype(jnp.float32)
    o_ref[...] = (x + p).astype(o_ref.dtype)


def _sublane_multiple(itemsize: int) -> int:
    return {4: 8, 2: 16, 1: 32}.get(itemsize, 8)


def _largest_divisor_tile(n: int, multiple: int, cap: int) -> int:
    """Largest t <= cap with t % multiple == 0 and n % t == 0; else full n."""
    if n <= cap:
        return n                        # full extent is always a legal block size
    t = cap - (cap % multiple)
    while t >= multiple:
        if n % t == 0:
            return t
        t -= multiple
    # TODO(synk): pathological factorizations (prime extents) fall back to the
    # full extent; fine for realistic transformer shapes.
    return n


def _forward_2d(x: jnp.ndarray, pe: jnp.ndarray) -> jnp.ndarray:
    """Aligned path: S*D is a multiple of 128."""
    B, S, D = x.shape
    L = pe.shape[0]
    C = S * D
    itemsize = jnp.dtype(x.dtype).itemsize

    x2 = x.reshape(B, C)
    # First S*D elements of the row-major (L, D) table ARE pe[:S] flattened, and
    # only column blocks < C // tC are ever indexed -> no HBM slice copy needed.
    # Cast to x.dtype so the held strip costs half the bytes for bf16 inputs.
    pe2 = pe.reshape(1, L * D).astype(x.dtype)

    sub = _sublane_multiple(itemsize)
    tR = _largest_divisor_tile(B, sub, min(B, 256))
    lane_cap = max(128, (_TILE_BYTES // (tR * itemsize)) // 128 * 128)
    tC = _largest_divisor_tile(C, 128, min(C, lane_cap))   # >=128 since C % 128 == 0

    cost = pl.CostEstimate(
        flops=B * C,
        transcendentals=0,
        bytes_accessed=2 * B * C * itemsize + C * itemsize,
    )

    out2 = pl.pallas_call(
        _add_pe_kernel,
        out_shape=jax.ShapeDtypeStruct((B, C), x.dtype),
        # Column axis OUTERMOST: pe's block index (0, c) is constant across the
        # inner row loop, so the (1, tC) strip is fetched once per column block.
        grid=(C // tC, B // tR),
        in_specs=[
            pl.BlockSpec((tR, tC), lambda c, r: (r, c)),
            pl.BlockSpec((1, tC), lambda c, r: (0, c)),
        ],
        out_specs=pl.BlockSpec((tR, tC), lambda c, r: (r, c)),
        compiler_params=pltpu.CompilerParams(
            dimension_semantics=("parallel", "parallel"),
            vmem_limit_bytes=_VMEM_LIMIT,
        ),
        cost_estimate=cost,
    )(x2, pe2)

    return out2.reshape(B, S, D)


def _forward_3d(x: jnp.ndarray, pe: jnp.ndarray) -> jnp.ndarray:
    """Unaligned fallback: S*D not a multiple of 128. Block S, keep D full."""
    B, S, D = x.shape
    itemsize = jnp.dtype(x.dtype).itemsize
    sub = _sublane_multiple(itemsize)

    pe_s = pe[:S, :].astype(x.dtype)                        # (S, D) slice

    row_cap = max(sub, (_TILE_BYTES // max(1, D * itemsize)) // sub * sub)
    tS = _largest_divisor_tile(S, sub, min(S, row_cap))

    cost = pl.CostEstimate(
        flops=B * S * D,
        transcendentals=0,
        bytes_accessed=2 * B * S * D * itemsize + S * D * itemsize,
    )

    return pl.pallas_call(
        _add_pe_kernel,
        out_shape=jax.ShapeDtypeStruct((B, S, D), x.dtype),
        # Seq axis OUTERMOST: the (tS, D) pe block is held across the batch.
        grid=(S // tS, B),
        in_specs=[
            pl.BlockSpec((1, tS, D), lambda s, b: (b, s, 0)),
            pl.BlockSpec((tS, D), lambda s, b: (s, 0)),
        ],
        out_specs=pl.BlockSpec((1, tS, D), lambda s, b: (b, s, 0)),
        compiler_params=pltpu.CompilerParams(
            dimension_semantics=("parallel", "parallel"),
            vmem_limit_bytes=_VMEM_LIMIT,
        ),
        cost_estimate=cost,
    )(x, pe_s)


def positional_encoding_forward(x: jnp.ndarray, pe: jnp.ndarray) -> jnp.ndarray:
    """x: (B, S, D); pe: (max_seq_length, D). Returns x + pe[None, :S, :] in x.dtype."""
    _, S, D = x.shape
    if (S * D) % 128 == 0:
        return _forward_2d(x, pe)
    return _forward_3d(x, pe)


if __name__ == "__main__":
    key = jax.random.PRNGKey(0)

    # Aligned (2D lane-dense) path: d_model=32, seq=8 -> S*D=256 (128-aligned).
    d_model, max_seq_length, batch, seq = 32, 16, 2, 8
    x = jax.random.normal(key, (batch, seq, d_model), dtype=jnp.float32)
    pe = _build_pe(d_model, max_seq_length)
    out = jax.block_until_ready(positional_encoding_forward(x, pe))
    ref = x + pe[None, :seq, :]
    assert out.shape == (batch, seq, d_model)
    assert jnp.allclose(out, ref, atol=1e-6), "2D path mismatch vs reference"

    # Unaligned fallback (3D) path: d_model=20 -> S*D=160 (not 128-aligned).
    d_model2 = 20
    x2 = jax.random.normal(jax.random.PRNGKey(0), (batch, seq, d_model2),
                           dtype=jnp.float32)
    pe2 = _build_pe(d_model2, max_seq_length)
    out2 = jax.block_until_ready(positional_encoding_forward(x2, pe2))
    ref2 = x2 + pe2[None, :seq, :]
    assert jnp.allclose(out2, ref2, atol=1e-6), "3D path mismatch vs reference"

    print("KERNEL_OK")
</pallas_src>

<mosaic_0001>
module attributes {stable_mosaic.version = 11 : i64} {
  func.func @_add_pe_kernel(%arg0: i32, %arg1: i32, %arg2: memref<2x256xf32, #tpu.memory_space<vmem>>, %arg3: memref<1x256xf32, #tpu.memory_space<vmem>>, %arg4: memref<2x256xf32, #tpu.memory_space<vmem>>) attributes {dimension_semantics = [#tpu.dimension_semantics<parallel>, #tpu.dimension_semantics<parallel>], iteration_bounds = array<i64: 1, 1>, scalar_prefetch = 0 : i64, scratch_operands = 0 : i64, tpu.core_type = #tpu.core_type<tc>, window_params = [{transform_indices = @transform_0, window_bounds = array<i64: 2, 256>}, {transform_indices = @transform_1, window_bounds = array<i64: 1, 256>}, {transform_indices = @transform_2, window_bounds = array<i64: 2, 256>}]} {
    %c0 = arith.constant 0 : index
    %c0_0 = arith.constant 0 : index
    %0 = vector.load %arg2[%c0, %c0_0] : memref<2x256xf32, #tpu.memory_space<vmem>>, vector<2x256xf32>
    %c0_1 = arith.constant 0 : index
    %c0_2 = arith.constant 0 : index
    %1 = vector.load %arg3[%c0_1, %c0_2] : memref<1x256xf32, #tpu.memory_space<vmem>>, vector<1x256xf32>
    %2 = vector.broadcast %1 : vector<1x256xf32> to vector<2x256xf32>
    %3 = arith.addf %0, %2 : vector<2x256xf32>
    %c0_3 = arith.constant 0 : index
    %c0_4 = arith.constant 0 : index
    %4 = vector.load %arg4[%c0_3, %c0_4] : memref<2x256xf32, #tpu.memory_space<vmem>>, vector<2x256xf32>
    tpu.vector_store %arg4[%c0_3, %c0_4], %3 {strides = array<i32>} : memref<2x256xf32, #tpu.memory_space<vmem>>, vector<2x256xf32>,
    return
  }
  func.func @transform_0(%arg0: i32, %arg1: i32) -> (i32, i32) {
    %c0_i32 = arith.constant 0 : i32
    return %arg1, %arg0 : i32, i32
  }
  func.func @transform_1(%arg0: i32, %arg1: i32) -> (i32, i32) {
    %c0_i32 = arith.constant 0 : i32
    %c0_i32_0 = arith.constant 0 : i32
    return %c0_i32, %arg0 : i32, i32
  }
  func.func @transform_2(%arg0: i32, %arg1: i32) -> (i32, i32) {
    %c0_i32 = arith.constant 0 : i32
    return %arg1, %arg0 : i32, i32
  }
}

</mosaic_0001>

<bundles_post_ra>
// kernel: tpu_custom_call.1
= control target key start
LH: loop header
LB: loop body
LE: loop exit
PB: predicated region body
PF: predicated region fallthrough
CT: control target
= control target key end

     0   :  { %7 = vsyncpa [#allocation3], 0  ;;  %s215_s0 = inlined_call_operand.hbm [shape: f32[2,256], index: 0, kind: input, shape index: {}]   ;;  %s216_s1 = inlined_call_operand.hbm [shape: f32[1,512], index: 1, kind: input, shape index: {}]   ;;  %s217_s2 = inlined_call_operand.hbm [shape: f32[2,256], index: 2, kind: output, shape index: {}]  }
   0x1   :  { %8 = vsyncpa [#allocation6], 0 }
   0x2   :  { %9 = vsyncpa [#allocation4], 0  ;;  %s150_s9 = smov [#allocation2]   ;;  %s151_s11 = smov [#allocation5]  }
   0x3   :  { %s16_s10 = sshll.u32 %s150_s9, 4  ;;  %s26_s12 = sshll.u32 %s151_s11, 4  ;;  %s17_s10 = int_to_ptr.vmem [resolvable:$true] %s16_s10  ;;  %s169_s12 = int_to_ptr.vmem [resolvable:$true] %s26_s12 }
   0x4   :  { %s78_s15 = scalar_lea.hbm %s215_s0, 64 }
   0x5   :  { %p79_p0 = scmp.ne.s32.totalorder %s215_s0, %s78_s15  ;;  %p82_p1 = scmp.lt.u32.totalorder %s78_s15, %s215_s0 }
   0x7   :  { %p84_p2 = pnand %p82_p1, %p79_p0 }
   0x9   :  { %87 = shalt.err (!%p84_p2)
}
   0xa   :  { %s88_s20 = scalar_lea.vmem %s17_s10, 64  ;;  %p93_p4 = scmp.lt.s32.totalorder %s17_s10, %s17_s10 }
   0xb   :  { %p89_p3 = scmp.ne.s32.totalorder %s17_s10, %s88_s20  ;;  %p94_p5 = scmp.lt.s32.totalorder %s88_s20, %s88_s20 }
   0xd   :  { %p95_p6 = por %p94_p5, %p93_p4 }
   0xf   :  { %p96_p7 = pnand %p95_p6, %p89_p3 }
  0x11   :  { %99 = shalt.err (!%p96_p7)
}
  0x12   :  { %19 = dma.hbm_to_vmem [thread:$0]  %s215_s0, 64, %s17_s10, [#allocation3]  }
  0x13   :  { %s100_s25 = scalar_lea.hbm %s216_s1, 32  ;;  %s102_s30 = scalar_lea.hbm %s216_s1, 64 }
  0x14   :  { %p101_p8 = scmp.ne.s32.totalorder %s216_s1, %s100_s25  ;;  %p103_p9 = scmp.lt.u32.totalorder %s102_s30, %s100_s25 }
  0x15   :  { %p104_p10 = scmp.lt.u32.totalorder %s100_s25, %s216_s1 }
  0x17   :  { %p105_p11 = por %p104_p10, %p103_p9 }
  0x19   :  { %p106_p12 = pnand %p105_p11, %p101_p8 }
  0x1b   :  { %109 = shalt.err (!%p106_p12)
}
  0x1c   :  { %s110_s0 = scalar_lea.vmem %s169_s12, 32  ;;  %p115_p0 = scmp.lt.s32.totalorder %s169_s12, %s169_s12 }
  0x1d   :  { %p111_p13 = scmp.ne.s32.totalorder %s169_s12, %s110_s0  ;;  %p116_p1 = scmp.lt.s32.totalorder %s110_s0, %s110_s0 }
  0x1f   :  { %p117_p2 = por %p116_p1, %p115_p0 }
  0x21   :  { %p118_p3 = pnand %p117_p2, %p111_p13 }
  0x23   :  { %121 = shalt.err (!%p118_p3)
}
  0x24   :  { %29 = dma.hbm_to_vmem [thread:$0]  %s216_s1, 32, %s169_s12, [#allocation6]  }
  0x25   :  { %144 = dma.done.wait [#allocation3], 64  }
  0x26   :  { %145 = vsyncadd [#allocation3], 4294967232 }
  0x27   :  { %146 = dma.done.wait [#allocation6], 32  }
  0x28   :  { %147 = vsyncadd [#allocation6], 4294967264  ;;  %v39_v0 = vlaneseq  ;;  %v152_v1 = vmov 1983009808   ;;  %v37_v7 = vld [vmem:[#allocation5] sm:$0x3] }
  0x29   :  { %v49_v2 = vunpack.c.l.s4 %v152_v1  ;;  %v36_v12 = vld [vmem:[#allocation2] sm:$0xf]  ;;  %s153_s7 = smov [#allocation7]  }
  0x2a   :  { %v40_v3 = vshrl.u32 %v39_v0, 7  ;;  %s64_s8 = sshll.u32 %s153_s7, 4  ;;  %s65_s8 = int_to_ptr.vmem [resolvable:$true] %s64_s8 }
  0x2b   :  { %v50_v6 = vunpack.c.0.s8 %v49_v2  ;;  %s122_s1 = scalar_lea.vmem %s65_s8, 64  ;;  %p127_p5 = scmp.lt.s32.totalorder %s65_s8, %s65_s8 }
  0x2c   :  { %v41_v4 = vsub.s32 0, %v40_v3  ;;  %v45_v5 = vsub.s32 1, %v40_v3  ;;  %p123_p4 = scmp.ne.s32.totalorder %s65_s8, %s122_s1  ;;  %p128_p6 = scmp.lt.s32.totalorder %s122_s1, %s122_s1 }
  0x2d   :  { %v53_v10 = vsub.s32 %v50_v6, %v40_v3 }
  0x2e   :  { %v42_v8 = vrot.slane %v37_v7, %v41_v4  ;;  %v46_v9 = vrot.slane %v37_v7, %v45_v5  ;;  %p129_p7 = por %p128_p6, %p127_p5 }
  0x30   :  { %v47_v11 = vcombine.low %v42_v8, %v46_v9  ;;  %p130_p8 = pnand %p129_p7, %p123_p4 }
  0x32   :  { %v54_v13 = vrot.slane %v47_v11, %v53_v10 }
  0x34   :  { %v56_v14 = vadd.f32 %v54_v13, %v36_v12 }
  0x36   :  { %57 = vst [vmem:[#allocation7] sm:$0xf] %v56_v14 }
  0x37   :  { %133 = shalt.err (!%p130_p8)
}
  0x38   :  { %s134_s11 = scalar_lea.hbm %s217_s2, 64 }
  0x39   :  { %p135_p9 = scmp.ne.s32.totalorder %s217_s2, %s134_s11  ;;  %p138_p10 = scmp.lt.u32.totalorder %s134_s11, %s217_s2 }
  0x3b   :  { %p140_p11 = pnand %p138_p10, %p135_p9 }
  0x3d   :  { %143 = shalt.err (!%p140_p11)
}
  0x3e   :  { %67 = dma.vmem_to_hbm [thread:$0]  %s65_s8, 64, %s217_s2, [#allocation4]  }
  0x3f   :  { %148 = dma.done.wait [#allocation4], 64  }
  0x40   :  { %149 = vsyncadd [#allocation4], 4294967232 }
  0x41   :  { %71 = vsyncpa [#allocation3], 1 }
  0x42   :  { %72 = vsyncpa [#allocation6], 1 }
  0x43   :  { %73 = vsyncpa [#allocation4], 1 }

</bundles_post_ra>
